<compile_context>
chip_gen: v7x
topology: tpu7x:2x2x1
jax: 0.10.0
libtpu: 0.0.40
codegen_flags: <defaults>
</compile_context>

<pallas_src>
import numpy as np
import jax
import jax.numpy as jnp
from jax.experimental import pallas as pl
from jax.experimental.pallas import tpu as pltpu


def _block_diag(mats):
    rows = sum(m.shape[0] for m in mats)
    cols = sum(m.shape[1] for m in mats)
    out = np.zeros((rows, cols), dtype=np.float32)
    r = c = 0
    for m in mats:
        out[r:r + m.shape[0], c:c + m.shape[1]] = m
        r += m.shape[0]
        c += m.shape[1]
    return out


def _make_kernel(num_layers):
    """One grid step: fused multi-scale row-wise MLP on the pre-gathered sensor rows."""

    def kernel(x_ref, *refs):
        # refs = (W_0..W_{L-1}, b_0..b_{L-1}, out)
        w_refs = refs[:num_layers]
        b_refs = refs[num_layers:2 * num_layers]
        o_ref = refs[2 * num_layers]

        h = x_ref[...]
        for l in range(num_layers):
            h = jnp.dot(h, w_refs[l][...], preferred_element_type=jnp.float32)
            h = jnp.maximum(h + b_refs[l][...], 0.0)   # ReLU after every layer (incl. last)
        o_ref[...] = h

    return kernel


def build_static_features(edge_attribute, weights, biases, sensor_indexes):
    """Host-side, once-per-model preparation (NOT jitted / not per-call).

    edge_attribute : [N_roads, F_in]
    weights        : list of [S, F_prev, F_cur] (one entry per layer)
    biases         : list of [S, 1, F_cur]
    sensor_indexes : [N_sensors] int
    Returns (x_sel_pad, fused_w, fused_b, n_sensors).
    """
    edge_attribute = np.asarray(edge_attribute, dtype=np.float32)
    sensor_indexes = np.asarray(sensor_indexes, dtype=np.int64)
    N, F_in = edge_attribute.shape
    S = np.asarray(weights[0]).shape[0]
    num_layers = len(weights)

    # Clamp indices host-side so there is never a silent OOB VMEM read.
    idx = np.clip(sensor_indexes, 0, N - 1)
    n_sensors = int(idx.shape[0])
    n_pad = max(8, -(-n_sensors // 8) * 8)           # pad rows to a multiple of 8 (sublanes)

    x_sel = np.zeros((n_pad, F_in), dtype=np.float32)
    x_sel[:n_sensors] = edge_attribute[idx]

    # Weight fusion (exact algebra):
    #   layer 0 : concat per-scale [F_in, F0] along outputs  -> [F_in, S*F0]
    #   layer l : block-diagonal of per-scale [F_{l-1}, F_l] -> [S*F_{l-1}, S*F_l]
    #   biases  : concat along the feature axis              -> [1, S*F_l]
    fused_w, fused_b = [], []
    for l in range(num_layers):
        w = np.asarray(weights[l], dtype=np.float32)
        b = np.asarray(biases[l], dtype=np.float32)
        if l == 0:
            wf = np.concatenate([w[s] for s in range(S)], axis=1)
        else:
            wf = _block_diag([w[s] for s in range(S)])
        bf = np.concatenate([b[s] for s in range(S)], axis=1)
        fused_w.append(jnp.asarray(wf))
        fused_b.append(jnp.asarray(bf))

    return jnp.asarray(x_sel), tuple(fused_w), tuple(fused_b), n_sensors


def static_features_apply(x_sel, fused_w, fused_b):
    """Jittable forward on the pre-gathered sensor rows. Returns [n_pad, S*F_last]."""
    num_layers = len(fused_w)
    n_pad, f_in = x_sel.shape
    f_out_tot = fused_w[-1].shape[-1]

    # Full-array blocks, single grid step; everything fits comfortably in VMEM (<50 KB).
    in_specs = [pl.BlockSpec(x_sel.shape, lambda i: (0, 0))]
    for w in fused_w:
        in_specs.append(pl.BlockSpec(w.shape, lambda i: (0, 0)))
    for b in fused_b:
        in_specs.append(pl.BlockSpec(b.shape, lambda i: (0, 0)))
    out_spec = pl.BlockSpec((n_pad, f_out_tot), lambda i: (0, 0))

    flops = sum(2 * n_pad * int(w.shape[0]) * int(w.shape[1]) for w in fused_w)
    bytes_accessed = 4 * (int(x_sel.size)
                          + sum(int(w.size) for w in fused_w)
                          + sum(int(b.size) for b in fused_b)
                          + n_pad * int(f_out_tot))
    cost = pl.CostEstimate(flops=flops, transcendentals=0, bytes_accessed=bytes_accessed)

    return pl.pallas_call(
        _make_kernel(num_layers),
        out_shape=jax.ShapeDtypeStruct((n_pad, f_out_tot), jnp.float32),
        grid_spec=pl.GridSpec(grid=(1,), in_specs=in_specs, out_specs=out_spec),
        compiler_params=pltpu.CompilerParams(dimension_semantics=("arbitrary",)),
        cost_estimate=cost,
    )(x_sel, *fused_w, *fused_b)


if __name__ == "__main__":
    key = jax.random.PRNGKey(0)

    # Small shapes consistent with the module:
    N_roads = 64              # connections_road.shape[-1]
    F_in = 8                  # edge_attribute feature length
    feature_sizes = [32, 16]  # args.static_gcn_feature_size
    S = 3                     # args.number_of_scales
    sensor_indexes = jnp.array([1, 5, 17, 42], dtype=jnp.int32)

    keys = jax.random.split(key, 1 + 2 * len(feature_sizes))
    edge_attribute = jax.random.normal(keys[0], (N_roads, F_in), dtype=jnp.float32)

    # Deterministic synthetic parameters (one Linear per layer, per scale).
    weights, biases = [], []
    prev = F_in
    for i, f in enumerate(feature_sizes):
        wk, bk = keys[1 + 2 * i], keys[2 + 2 * i]
        weights.append(0.1 * jax.random.normal(wk, (S, prev, f), dtype=jnp.float32))
        biases.append(0.1 * jax.random.normal(bk, (S, 1, f), dtype=jnp.float32))
        prev = f

    # --- build once (host-side weight fusion + sensor-row gather, outside jit) ---
    x_sel, fused_w, fused_b, n_sensors = build_static_features(
        edge_attribute, weights, biases, sensor_indexes)

    # --- per-call forward: just the Pallas kernel ---
    fwd = jax.jit(static_features_apply)
    out_pad = fwd(x_sel, fused_w, fused_b)
    out_pad = jax.block_until_ready(out_pad)
    out = out_pad[:n_sensors]

    # Pure-JAX reference check (matches the PyTorch forward semantics).
    ref_parts = []
    for s in range(S):
        h = edge_attribute
        for w, b in zip(weights, biases):
            h = jnp.maximum(h @ w[s] + b[s], 0.0)
        ref_parts.append(h[sensor_indexes])
    ref = jnp.concatenate(ref_parts, axis=1)

    assert out.shape == (sensor_indexes.shape[0], S * feature_sizes[-1]), out.shape
    assert jnp.allclose(out, ref, atol=1e-5, rtol=1e-5)
    print("KERNEL_OK")
</pallas_src>

<mosaic_0001>
module attributes {stable_mosaic.version = 11 : i64} {
  func.func @kernel(%arg0: i32, %arg1: memref<8x8xf32, #tpu.memory_space<vmem>>, %arg2: memref<8x96xf32, #tpu.memory_space<vmem>>, %arg3: memref<96x48xf32, #tpu.memory_space<vmem>>, %arg4: memref<1x96xf32, #tpu.memory_space<vmem>>, %arg5: memref<1x48xf32, #tpu.memory_space<vmem>>, %arg6: memref<8x48xf32, #tpu.memory_space<vmem>>) attributes {dimension_semantics = [#tpu.dimension_semantics<arbitrary>], iteration_bounds = array<i64: 1>, scalar_prefetch = 0 : i64, scratch_operands = 0 : i64, tpu.core_type = #tpu.core_type<tc>, window_params = [{pipeline_mode = #tpu.pipeline_mode<synchronous>, transform_indices = @transform_0, window_bounds = array<i64: 8, 8>}, {pipeline_mode = #tpu.pipeline_mode<synchronous>, transform_indices = @transform_1, window_bounds = array<i64: 8, 96>}, {pipeline_mode = #tpu.pipeline_mode<synchronous>, transform_indices = @transform_2, window_bounds = array<i64: 96, 48>}, {pipeline_mode = #tpu.pipeline_mode<synchronous>, transform_indices = @transform_3, window_bounds = array<i64: 1, 96>}, {pipeline_mode = #tpu.pipeline_mode<synchronous>, transform_indices = @transform_4, window_bounds = array<i64: 1, 48>}, {pipeline_mode = #tpu.pipeline_mode<synchronous>, transform_indices = @transform_5, window_bounds = array<i64: 8, 48>}]} {
    %c0 = arith.constant 0 : index
    %c0_0 = arith.constant 0 : index
    %0 = vector.load %arg1[%c0, %c0_0] : memref<8x8xf32, #tpu.memory_space<vmem>>, vector<8x8xf32>
    %c0_1 = arith.constant 0 : index
    %c0_2 = arith.constant 0 : index
    %1 = vector.load %arg2[%c0_1, %c0_2] : memref<8x96xf32, #tpu.memory_space<vmem>>, vector<8x96xf32>
    %cst = arith.constant dense<0.000000e+00> : vector<8x96xf32>
    %2 = tpu.matmul %0, %1, %cst {dimension_numbers = #tpu.dot_dimension_numbers<[1], [0], [0], [1], [0, 0, 1, 1], [], []>} : vector<8x8xf32>, vector<8x96xf32>, vector<8x96xf32> -> vector<8x96xf32>
    %c0_3 = arith.constant 0 : index
    %c0_4 = arith.constant 0 : index
    %3 = vector.load %arg4[%c0_3, %c0_4] : memref<1x96xf32, #tpu.memory_space<vmem>>, vector<1x96xf32>
    %4 = vector.broadcast %3 : vector<1x96xf32> to vector<8x96xf32>
    %5 = arith.addf %2, %4 : vector<8x96xf32>
    %cst_5 = arith.constant 0.000000e+00 : f32
    %6 = vector.broadcast %cst_5 : f32 to vector<8x96xf32>
    %7 = arith.maximumf %5, %6 : vector<8x96xf32>
    %c0_6 = arith.constant 0 : index
    %c0_7 = arith.constant 0 : index
    %8 = vector.load %arg3[%c0_6, %c0_7] : memref<96x48xf32, #tpu.memory_space<vmem>>, vector<96x48xf32>
    %cst_8 = arith.constant dense<0.000000e+00> : vector<8x48xf32>
    %9 = tpu.matmul %7, %8, %cst_8 {dimension_numbers = #tpu.dot_dimension_numbers<[1], [0], [0], [1], [0, 0, 1, 1], [], []>} : vector<8x96xf32>, vector<96x48xf32>, vector<8x48xf32> -> vector<8x48xf32>
    %c0_9 = arith.constant 0 : index
    %c0_10 = arith.constant 0 : index
    %10 = vector.load %arg5[%c0_9, %c0_10] : memref<1x48xf32, #tpu.memory_space<vmem>>, vector<1x48xf32>
    %11 = vector.broadcast %10 : vector<1x48xf32> to vector<8x48xf32>
    %12 = arith.addf %9, %11 : vector<8x48xf32>
    %cst_11 = arith.constant 0.000000e+00 : f32
    %13 = vector.broadcast %cst_11 : f32 to vector<8x48xf32>
    %14 = arith.maximumf %12, %13 : vector<8x48xf32>
    %c0_12 = arith.constant 0 : index
    %c0_13 = arith.constant 0 : index
    %15 = vector.load %arg6[%c0_12, %c0_13] : memref<8x48xf32, #tpu.memory_space<vmem>>, vector<8x48xf32>
    tpu.vector_store %arg6[%c0_12, %c0_13], %14 {strides = array<i32>} : memref<8x48xf32, #tpu.memory_space<vmem>>, vector<8x48xf32>,
    return
  }
  func.func @transform_0(%arg0: i32) -> (i32, i32) {
    %c0_i32 = arith.constant 0 : i32
    %c0_i32_0 = arith.constant 0 : i32
    %c0_i32_1 = arith.constant 0 : i32
    return %c0_i32, %c0_i32_0 : i32, i32
  }
  func.func @transform_1(%arg0: i32) -> (i32, i32) {
    %c0_i32 = arith.constant 0 : i32
    %c0_i32_0 = arith.constant 0 : i32
    %c0_i32_1 = arith.constant 0 : i32
    return %c0_i32, %c0_i32_0 : i32, i32
  }
  func.func @transform_2(%arg0: i32) -> (i32, i32) {
    %c0_i32 = arith.constant 0 : i32
    %c0_i32_0 = arith.constant 0 : i32
    %c0_i32_1 = arith.constant 0 : i32
    return %c0_i32, %c0_i32_0 : i32, i32
  }
  func.func @transform_3(%arg0: i32) -> (i32, i32) {
    %c0_i32 = arith.constant 0 : i32
    %c0_i32_0 = arith.constant 0 : i32
    %c0_i32_1 = arith.constant 0 : i32
    return %c0_i32, %c0_i32_0 : i32, i32
  }
  func.func @transform_4(%arg0: i32) -> (i32, i32) {
    %c0_i32 = arith.constant 0 : i32
    %c0_i32_0 = arith.constant 0 : i32
    %c0_i32_1 = arith.constant 0 : i32
    return %c0_i32, %c0_i32_0 : i32, i32
  }
  func.func @transform_5(%arg0: i32) -> (i32, i32) {
    %c0_i32 = arith.constant 0 : i32
    %c0_i32_0 = arith.constant 0 : i32
    %c0_i32_1 = arith.constant 0 : i32
    return %c0_i32, %c0_i32_0 : i32, i32
  }
}

</mosaic_0001>

<bundles_post_ra>
// kernel: static_features_apply.1
= control target key start
LH: loop header
LB: loop body
LE: loop exit
PB: predicated region body
PF: predicated region fallthrough
CT: control target
= control target key end

     0   :  { %vm30_vm0 = vcmask 64512   ;;  %v312_v2 = vmov 0.0   ;;  %vm313_vm1 = vmmov 0   ;;  %v314_v6 = vmov 0.0|0.0   ;;  %s406_s0 = inlined_call_operand.vmem [shape: f32[8,8], index: 0, kind: input, shape index: {}]   ;;  %s407_s1 = inlined_call_operand.vmem [shape: f32[8,96], index: 1, kind: input, shape index: {}]   ;;  %s408_s2 = inlined_call_operand.vmem [shape: f32[96,48], index: 2, kind: input, shape index: {}]   ;;  %s409_s3 = inlined_call_operand.vmem [shape: f32[1,96], index: 3, kind: input, shape index: {}]   ;;  %s410_s4 = inlined_call_operand.vmem [shape: f32[1,48], index: 4, kind: input, shape index: {}]   ;;  %s411_s5 = inlined_call_operand.hbm [shape: f32[8,48], index: 5, kind: output, shape index: {}]  }
   0x1   :  { %v22_v0 = vld [vmem:[%s407_s1] sm:$0xff]  ;;  %234 = vmatprep.subr.mxu0 %v312_v2  ;;  %236 = vmatprep.mubr.msk.f32.mxu0 %vm313_vm1, %v312_v2  ;;  %v106_v4 = vld [vmem:[%s408_s2 + $0x8] sm:$0xff]  ;;  %v107_v5 = vld [vmem:[%s408_s2 + $0x10] sm:$0xff] }
   0x2   :  { %v21_v1 = vld [vmem:[%s406_s0] sm:$0xff]  ;;  %235 = vmatpush3.msra.mxu0 %v22_v0  ;;  %266 = vmatprep.subr.bf16.mxu1 %v314_v6  ;;  %v108_v8 = vld [vmem:[%s408_s2 + $0x18] sm:$0xff] }
   0x3   :  { %v105_v3 = vld [vmem:[%s408_s2] sm:$0xff]  ;;  %237 = vmatmul.mubr.msk.f32.vlgmr.msra.gmra.mrb[0].mxu0 %vm30_vm0, %v21_v1  ;;  %263 = vmatprep.mubr.msk.f32.mxu1 %vm313_vm1, %v312_v2  ;;  %v270_v9 = vpack.c.bf16 %v108_v8, %v107_v5 }
   0x4   :  { %v267_v7 = vpack.c.bf16 %v106_v4, %v105_v3 }
   0x6   :  { %268 = vmatpush3.bf16.msra.mxu1 %v267_v7 }
   0x7   :  { %10 = vsyncpa [#allocation3], 0  ;;  %269 = vmatprep.subr.bf16.mxu1 %v314_v6  ;;  %v109_v10 = vld [vmem:[%s408_s2 + $0x20] sm:$0xff]  ;;  %v110_v11 = vld [vmem:[%s408_s2 + $0x28] sm:$0xff]  ;;  %vm124_vm2 = vcmask 785408   ;;  %s315_s23 = smov [#allocation2]  }
   0x8   :  { %v273_v12 = vpack.c.bf16 %v110_v11, %v109_v10  ;;  %v111_v13 = vld [vmem:[%s408_s2 + $0x30] sm:$0xff]  ;;  %v112_v14 = vld [vmem:[%s408_s2 + $0x38] sm:$0xff]  ;;  %v113_v16 = vld [vmem:[%s408_s2 + $0x40] sm:$0xff]  ;;  %s207_s24 = sshll.u32 %s315_s23, 4  ;;  %vm199_vm3 = vcmask 392192   ;;  %s208_s24 = int_to_ptr.vmem [resolvable:$true] %s207_s24 }
   0x9   :  { %v276_v15 = vpack.c.bf16 %v112_v14, %v111_v13  ;;  %v114_v17 = vld [vmem:[%s408_s2 + $0x48] sm:$0xff]  ;;  %v115_v19 = vld [vmem:[%s408_s2 + $0x50] sm:$0xff]  ;;  %v116_v20 = vld [vmem:[%s408_s2 + $0x58] sm:$0xff]  ;;  %s288_s2 = scalar_lea.vmem %s208_s24, 128  ;;  %p293_p1 = scmp.lt.s32.totalorder %s208_s24, %s208_s24 }
   0xa   :  { %271 = vmatpush3.bf16.msra.mxu1 %v270_v9  ;;  %v279_v18 = vpack.c.bf16 %v114_v17, %v113_v16  ;;  %v282_v21 = vpack.c.bf16 %v116_v20, %v115_v19  ;;  %v215_v22 = vld [vmem:[%s409_s3] ss:$0 sm:$0xff]  ;;  %p289_p0 = scmp.ne.s32.totalorder %s208_s24, %s288_s2  ;;  %p294_p2 = scmp.lt.s32.totalorder %s288_s2, %s288_s2 }
   0xb   :  { %272 = vmatprep.subr.bf16.mxu1 %v314_v6  ;;  %v217_v27 = vld [vmem:[%s410_s4] ss:$0 sm:$0xff] }
   0xc   :  { %p295_p3 = por %p294_p2, %p293_p1 }
   0xe   :  { %274 = vmatpush3.bf16.msra.mxu1 %v273_v12  ;;  %p296_p4 = pnand %p295_p3, %p289_p0 }
   0xf   :  { %275 = vmatprep.subr.bf16.mxu1 %v314_v6 }
  0x12   :  { %277 = vmatpush3.bf16.msra.mxu1 %v276_v15 }
  0x13   :  { %278 = vmatprep.subr.bf16.mxu1 %v314_v6 }
  0x16   :  { %280 = vmatpush3.bf16.msra.mxu1 %v279_v18 }
  0x17   :  { %281 = vmatprep.subr.bf16.mxu1 %v314_v6 }
  0x1a   :  { %283 = vmatpush3.bf16.msra.mxu1 %v282_v21 }
  0xd6   :  { %v100_v23 = vpop.f32.mrb[0].mxu0 }
  0xd7   :  { %v101_v24 = vadd.f32 %v215_v22, %v100_v23  ;;  %v238_v25 = vpop.f32.mrb[1].mxu0 }
  0xd9   :  { %v104_v26 = vmax.f32 %v101_v24, 0.0 }
  0xdb   :  { %264 = vmatmul.mubr.msk.f32.vlgmr.msra.gmra.mrb[0].mxu1 %vm124_vm2, %v104_v26 }
 0x1ae   :  { %v194_v28 = vpop.f32.mrb[0].mxu1 }
 0x1af   :  { %v195_v29 = vadd.f32 %v217_v27, %v194_v28  ;;  %v265_v30 = vpop.f32.mrb[1].mxu1 }
 0x1b1   :  { %v198_v31 = vmax.f32 %v195_v29, 0.0 }
 0x1b3   :  { %200 = vst.msk [vmem:[#allocation2] sm:$0xff] %vm199_vm3, %v198_v31 }
 0x1b4   :  { %299 = shalt.err (!%p296_p4)
}
 0x1b5   :  { %s300_s4 = scalar_lea.hbm %s411_s5, 128 }
 0x1b6   :  { %p301_p5 = scmp.ne.s32.totalorder %s411_s5, %s300_s4  ;;  %p304_p6 = scmp.lt.u32.totalorder %s300_s4, %s411_s5 }
 0x1b8   :  { %p306_p7 = pnand %p304_p6, %p301_p5 }
 0x1ba   :  { %309 = shalt.err (!%p306_p7)
}
 0x1bb   :  { %210 = dma.vmem_to_hbm [thread:$0]  %s208_s24, 128, %s411_s5, [#allocation3]  }
 0x1bc   :  { %310 = dma.done.wait [#allocation3], 128  }
 0x1bd   :  { %311 = vsyncadd [#allocation3], 4294967168 }
 0x1be   :  { %214 = vsyncpa [#allocation3], 1 }

</bundles_post_ra>
